<compile_context>
chip_gen: v7x
topology: tpu7x:2x2x1
jax: 0.10.0
libtpu: 0.0.40
codegen_flags: <defaults>
</compile_context>

<pallas_src>
import functools
import math

import jax
import jax.numpy as jnp
from jax.experimental import pallas as pl
from jax.experimental.pallas import tpu as pltpu


def _round_up(n, m):
    return ((n + m - 1) // m) * m


def _adapter_kernel(x_ref, wd_ref, bd_ref, wu_ref, bu_ref, o_ref, *,
                    adapter_type, eps, mxu_dtype):
    """One (rt, in_dim) tile of tokens.

    LayerNorm affine (gamma/beta) and the adapter `scale` are pre-folded into
    wd/bd and wu/bu on the host, so the kernel is:
        xhat -> dot(wd)+bd -> relu -> dot(wu)+bu  [-> +x]
    """
    x = x_ref[...].astype(jnp.float32)
    inv_d = 1.0 / float(x.shape[-1])

    # --- Two-pass LayerNorm statistics (numerically robust, f32) ---
    mu = jnp.sum(x, axis=-1, keepdims=True) * inv_d
    xc = x - mu
    var = jnp.sum(xc * xc, axis=-1, keepdims=True) * inv_d
    xhat = xc * jax.lax.rsqrt(var + eps)

    # --- down_proj (gamma folded into wd, beta@wd folded into bd) + ReLU ---
    h = jnp.dot(xhat.astype(mxu_dtype), wd_ref[...],
                preferred_element_type=jnp.float32)
    h = jnp.maximum(h + bd_ref[...], 0.0)

    # --- up_proj (scale folded into wu/bu) ---
    out = jnp.dot(h.astype(mxu_dtype), wu_ref[...],
                  preferred_element_type=jnp.float32)
    out = out + bu_ref[...]

    if adapter_type == 'parallel':
        out = out + x
    # 'sequential' returns just the adapter branch.
    o_ref[...] = out.astype(o_ref.dtype)


def prepare_adapter_params(params, *, scale=0.1, mxu_dtype=jnp.bfloat16):
    """One-time host-side weight prep: fold LN affine + scale, pad, cast.

    Hoist this out of the per-call path when calling the adapter repeatedly;
    `adapter_forward` also accepts the raw param dict and will call it itself.
    """
    f32 = jnp.float32
    gamma = params['gamma'].astype(f32)              # [in_dim]
    beta = params['beta'].astype(f32)                # [in_dim]
    wd = params['w_down'].astype(f32)                # [in_dim, bottle]
    bd = params['b_down'].astype(f32)                # [bottle]
    wu = params['w_up'].astype(f32) * float(scale)   # [bottle, in_dim]
    bu = params['b_up'].astype(f32) * float(scale)   # [in_dim]

    in_dim, bottle = wd.shape

    # Fold LayerNorm affine into the down projection (exact in f32):
    #   (xhat*gamma + beta) @ wd + bd == xhat @ (gamma[:,None]*wd) + (beta@wd + bd)
    bd = beta @ wd + bd
    wd = gamma[:, None] * wd

    # Pad bottle dim to a lane-friendly multiple of 128 (zeros are inert
    # through ReLU / up_proj).
    bp = _round_up(max(bottle, 128), 128)
    if bp != bottle:
        wd = jnp.pad(wd, ((0, 0), (0, bp - bottle)))
        bd = jnp.pad(bd, ((0, bp - bottle),))
        wu = jnp.pad(wu, ((0, bp - bottle), (0, 0)))

    return {
        'wd': wd.astype(mxu_dtype),      # [in_dim, bp]   MXU operand (bf16)
        'bd': bd.reshape(1, bp),         # [1, bp]        f32
        'wu': wu.astype(mxu_dtype),      # [bp, in_dim]   MXU operand (bf16)
        'bu': bu.reshape(1, in_dim),     # [1, in_dim]    f32
    }


def adapter_forward(x, params, *, scale=0.1, adapter_type='parallel', eps=1e-5,
                    row_tile=512, mxu_dtype=jnp.bfloat16):
    """x: [..., in_dim].  params: raw dict (gamma/beta/w_down/b_down/w_up/b_up)
    or the output of prepare_adapter_params (preferred: prepare once, reuse)."""
    if 'wd' not in params:
        params = prepare_adapter_params(params, scale=scale, mxu_dtype=mxu_dtype)
    wd, bd, wu, bu = params['wd'], params['bd'], params['wu'], params['bu']

    orig_shape = x.shape
    in_dim = orig_shape[-1]
    assert wd.shape[0] == in_dim and wu.shape[1] == in_dim
    bp = wd.shape[1]
    x2d = x.reshape(-1, in_dim)
    n_rows = x2d.shape[0]

    # ---- Generation-aware VMEM budget (v5e/v6e: 128 MiB phys, v7x: 64 MiB). ----
    try:
        info = pltpu.get_tpu_info()
        vmem_cap = int(getattr(info, 'vmem_capacity_bytes', 64 << 20))
    except Exception:
        vmem_cap = 64 << 20                       # conservative fallback (v7x)
    budget = min((vmem_cap * 3) // 4, 100 << 20)  # leave Mosaic scratch headroom

    x_item = x2d.dtype.itemsize
    w_item = jnp.dtype(mxu_dtype).itemsize
    weight_bytes = (wd.size + wu.size) * w_item + (bd.size + bu.size) * 4

    def vmem_need(rt_):
        tiles = 2 * rt_ * in_dim * (x_item + x_item)       # x + out, double-buffered
        temps = (6 * rt_ * in_dim + 3 * rt_ * bp) * 4      # f32 kernel temporaries
        return tiles + temps + weight_bytes

    # ---- Row tiling: multiple of 16 sublanes; no host-side row pad (ragged
    #      last block handled by the grid; OOB rows are dropped on store). ----
    rt = _round_up(max(16, int(row_tile)), 16)
    rt = min(rt, _round_up(n_rows, 16))
    if n_rows > 16:                 # ensure >= 2 grid steps so v7x's 2 TCs split work
        rt = min(rt, _round_up(pl.cdiv(n_rows, 2), 16))
    while vmem_need(rt) > budget and rt > 16:
        rt = max(16, _round_up(rt // 2, 16))
    grid = (pl.cdiv(n_rows, rt),)

    # Always pass an explicit limit (>= 32 MiB) so v5e never sits on its ~16 MiB
    # default scoped limit; clamp to the per-generation budget.
    vmem_limit = int(min(max(vmem_need(rt) * 5 // 4, 32 << 20), budget))

    kernel = functools.partial(_adapter_kernel, adapter_type=adapter_type,
                               eps=float(eps), mxu_dtype=mxu_dtype)

    cost = pl.CostEstimate(
        flops=4 * n_rows * in_dim * bp + 10 * n_rows * in_dim,
        transcendentals=n_rows,
        bytes_accessed=2 * n_rows * in_dim * x_item + weight_bytes,
    )

    vmem_space = pltpu.MemorySpace.VMEM
    out2d = pl.pallas_call(
        kernel,
        out_shape=jax.ShapeDtypeStruct((n_rows, in_dim), x.dtype),
        grid_spec=pltpu.PrefetchScalarGridSpec(
            num_scalar_prefetch=0,
            grid=grid,
            in_specs=[
                pl.BlockSpec((rt, in_dim), lambda i: (i, 0)),   # x tile (pipelined)
                # Grid-invariant operands: whole-array VMEM residency, no
                # per-step double-buffered DMA.
                pl.BlockSpec(memory_space=vmem_space),          # wd (bf16, gamma-folded)
                pl.BlockSpec(memory_space=vmem_space),          # bd (f32, beta-folded)
                pl.BlockSpec(memory_space=vmem_space),          # wu (bf16, *scale)
                pl.BlockSpec(memory_space=vmem_space),          # bu (f32, *scale)
            ],
            out_specs=pl.BlockSpec((rt, in_dim), lambda i: (i, 0)),
        ),
        compiler_params=pltpu.CompilerParams(
            dimension_semantics=("parallel",),
            vmem_limit_bytes=vmem_limit),
        cost_estimate=cost,
    )(x2d, wd, bd, wu, bu)

    return out2d.reshape(orig_shape)


def init_adapter_params(key, in_dim, bottle_dim, dtype=jnp.float32):
    """Deterministic init mirroring the PyTorch __init__:
       - ln: gamma=1, beta=0
       - down_proj.weight: kaiming_normal_(a=sqrt(5))  (fan_in = in_dim)
       - down_proj.bias = 0, up_proj.weight = 0, up_proj.bias = 0
    """
    gain = math.sqrt(2.0 / (1.0 + 5.0))          # a = sqrt(5)
    std = gain / math.sqrt(in_dim)
    w_down_pt = std * jax.random.normal(key, (bottle_dim, in_dim), dtype=dtype)
    return {
        'gamma': jnp.ones((in_dim,), dtype),
        'beta': jnp.zeros((in_dim,), dtype),
        'w_down': w_down_pt.T,                       # [in_dim, bottle_dim]
        'b_down': jnp.zeros((bottle_dim,), dtype),
        'w_up': jnp.zeros((bottle_dim, in_dim), dtype),  # zero-init per module
        'b_up': jnp.zeros((in_dim,), dtype),
    }


def adapter_reference(x, params, *, scale=0.1, adapter_type='parallel',
                      eps=1e-5, mxu_dtype=jnp.bfloat16):
    """Pure-JAX reference mirroring the kernel's folded / bf16-operand math."""
    p = params if 'wd' in params else prepare_adapter_params(
        params, scale=scale, mxu_dtype=mxu_dtype)
    xf = x.astype(jnp.float32)
    mu = jnp.mean(xf, axis=-1, keepdims=True)
    xc = xf - mu
    var = jnp.mean(xc * xc, axis=-1, keepdims=True)
    xhat = xc * jax.lax.rsqrt(var + eps)
    h = jnp.dot(xhat.astype(mxu_dtype), p['wd'],
                preferred_element_type=jnp.float32) + p['bd']
    h = jnp.maximum(h, 0.0)
    out = jnp.dot(h.astype(mxu_dtype), p['wu'],
                  preferred_element_type=jnp.float32) + p['bu']
    if adapter_type == 'parallel':
        out = out + xf
    return out.astype(x.dtype)


if __name__ == "__main__":
    key = jax.random.PRNGKey(0)
    k_x, k_w, k_wu, k_bu, k_g, k_b, k_x2, k_x3 = jax.random.split(key, 8)

    batch, seq, in_dim, bottle_dim = 2, 8, 32, 8
    x = jax.random.normal(k_x, (batch, seq, in_dim), dtype=jnp.float32)

    # --- Test 1: faithful PyTorch init (up_proj zero) -> parallel out == x ---
    params = init_adapter_params(k_w, in_dim, bottle_dim)
    out = adapter_forward(x, params, scale=0.1, adapter_type='parallel')
    out = jax.block_until_ready(out)
    assert out.shape == x.shape and out.dtype == x.dtype
    assert jnp.allclose(out, x, atol=1e-5, rtol=1e-5)

    # --- Test 2: non-trivial gamma/beta/up_proj, non-divisible rows (21) ---
    x2 = jax.random.normal(k_x2, (3, 7, in_dim), dtype=jnp.float32)
    params2 = dict(params)
    params2['gamma'] = 1.0 + 0.1 * jax.random.normal(k_g, (in_dim,), jnp.float32)
    params2['beta'] = 0.05 * jax.random.normal(k_b, (in_dim,), jnp.float32)
    params2['w_up'] = 0.05 * jax.random.normal(k_wu, (bottle_dim, in_dim),
                                               dtype=jnp.float32)
    params2['b_up'] = 0.01 * jax.random.normal(k_bu, (in_dim,), jnp.float32)

    prepared2 = prepare_adapter_params(params2, scale=0.1)  # hoisted, reused below
    out2 = adapter_forward(x2, prepared2, adapter_type='parallel')
    out2 = jax.block_until_ready(out2)
    ref2 = adapter_reference(x2, params2, scale=0.1, adapter_type='parallel')
    assert out2.shape == x2.shape and out2.dtype == x2.dtype
    assert jnp.allclose(out2, ref2, atol=2e-3, rtol=2e-3)

    # --- Test 3: sequential variant (adapter branch only) ---
    out3 = adapter_forward(x2, prepared2, adapter_type='sequential')
    out3 = jax.block_until_ready(out3)
    ref3 = adapter_reference(x2, params2, scale=0.1, adapter_type='sequential')
    assert jnp.allclose(out3, ref3, atol=2e-3, rtol=2e-3)

    # --- Test 4: multi-tile grid with a ragged last block (260 rows, d=256) ---
    x3 = jax.random.normal(k_x3, (2, 130, 256), dtype=jnp.float32)
    params3 = init_adapter_params(k_w, 256, 16)
    params3['w_up'] = 0.05 * jax.random.normal(k_wu, (16, 256), dtype=jnp.float32)
    out4 = adapter_forward(x3, params3, scale=0.1, adapter_type='parallel')
    out4 = jax.block_until_ready(out4)
    ref4 = adapter_reference(x3, params3, scale=0.1, adapter_type='parallel')
    assert jnp.allclose(out4, ref4, atol=2e-3, rtol=2e-3)

    print("KERNEL_OK")
</pallas_src>

<mosaic_0001>
module attributes {stable_mosaic.version = 11 : i64} {
  func.func @_adapter_kernel(%arg0: i32, %arg1: memref<16x32xf32, #tpu.memory_space<vmem>>, %arg2: memref<32x128xbf16, #tpu.memory_space<vmem>>, %arg3: memref<1x128xf32, #tpu.memory_space<vmem>>, %arg4: memref<128x32xbf16, #tpu.memory_space<vmem>>, %arg5: memref<1x32xf32, #tpu.memory_space<vmem>>, %arg6: memref<16x32xf32, #tpu.memory_space<vmem>>) attributes {dimension_semantics = [#tpu.dimension_semantics<parallel>], iteration_bounds = array<i64: 1>, scalar_prefetch = 0 : i64, scratch_operands = 0 : i64, tpu.core_type = #tpu.core_type<tc>, window_params = [{transform_indices = @transform_0, window_bounds = array<i64: 16, 32>}, {pipeline_mode = #tpu.pipeline_mode<synchronous>, transform_indices = @transform_1, window_bounds = array<i64: 32, 128>}, {pipeline_mode = #tpu.pipeline_mode<synchronous>, transform_indices = @transform_2, window_bounds = array<i64: 1, 128>}, {pipeline_mode = #tpu.pipeline_mode<synchronous>, transform_indices = @transform_3, window_bounds = array<i64: 128, 32>}, {pipeline_mode = #tpu.pipeline_mode<synchronous>, transform_indices = @transform_4, window_bounds = array<i64: 1, 32>}, {transform_indices = @transform_5, window_bounds = array<i64: 16, 32>}]} {
    %c0 = arith.constant 0 : index
    %c0_0 = arith.constant 0 : index
    %0 = vector.load %arg1[%c0, %c0_0] : memref<16x32xf32, #tpu.memory_space<vmem>>, vector<16x32xf32>
    %cst = arith.constant dense<0.000000e+00> : vector<16xf32>
    %1 = vector.multi_reduction <add>, %0, %cst [1] : vector<16x32xf32> to vector<16xf32>
    %2 = vector.shape_cast %1 : vector<16xf32> to vector<16x1xf32>
    %cst_1 = arith.constant 3.125000e-02 : f32
    %3 = vector.broadcast %cst_1 : f32 to vector<16x1xf32>
    %4 = arith.mulf %2, %3 : vector<16x1xf32>
    %5 = vector.broadcast %4 : vector<16x1xf32> to vector<16x32xf32>
    %6 = arith.subf %0, %5 : vector<16x32xf32>
    %7 = arith.mulf %6, %6 : vector<16x32xf32>
    %cst_2 = arith.constant dense<0.000000e+00> : vector<16xf32>
    %8 = vector.multi_reduction <add>, %7, %cst_2 [1] : vector<16x32xf32> to vector<16xf32>
    %9 = vector.shape_cast %8 : vector<16xf32> to vector<16x1xf32>
    %cst_3 = arith.constant 3.125000e-02 : f32
    %10 = vector.broadcast %cst_3 : f32 to vector<16x1xf32>
    %11 = arith.mulf %9, %10 : vector<16x1xf32>
    %cst_4 = arith.constant 9.99999974E-6 : f32
    %12 = vector.broadcast %cst_4 : f32 to vector<16x1xf32>
    %13 = arith.addf %11, %12 : vector<16x1xf32>
    %14 = math.rsqrt %13 : vector<16x1xf32>
    %15 = vector.broadcast %14 : vector<16x1xf32> to vector<16x32xf32>
    %16 = arith.mulf %6, %15 : vector<16x32xf32>
    %17 = arith.truncf %16 : vector<16x32xf32> to vector<16x32xbf16>
    %c0_5 = arith.constant 0 : index
    %c0_6 = arith.constant 0 : index
    %18 = vector.load %arg2[%c0_5, %c0_6] : memref<32x128xbf16, #tpu.memory_space<vmem>>, vector<32x128xbf16>
    %cst_7 = arith.constant dense<0.000000e+00> : vector<16x128xf32>
    %19 = tpu.matmul %17, %18, %cst_7 {dimension_numbers = #tpu.dot_dimension_numbers<[1], [0], [0], [1], [0, 0, 1, 1], [], []>} : vector<16x32xbf16>, vector<32x128xbf16>, vector<16x128xf32> -> vector<16x128xf32>
    %c0_8 = arith.constant 0 : index
    %c0_9 = arith.constant 0 : index
    %20 = vector.load %arg3[%c0_8, %c0_9] : memref<1x128xf32, #tpu.memory_space<vmem>>, vector<1x128xf32>
    %21 = vector.broadcast %20 : vector<1x128xf32> to vector<16x128xf32>
    %22 = arith.addf %19, %21 : vector<16x128xf32>
    %cst_10 = arith.constant 0.000000e+00 : f32
    %23 = vector.broadcast %cst_10 : f32 to vector<16x128xf32>
    %24 = arith.maximumf %22, %23 : vector<16x128xf32>
    %25 = arith.truncf %24 : vector<16x128xf32> to vector<16x128xbf16>
    %c0_11 = arith.constant 0 : index
    %c0_12 = arith.constant 0 : index
    %26 = vector.load %arg4[%c0_11, %c0_12] : memref<128x32xbf16, #tpu.memory_space<vmem>>, vector<128x32xbf16>
    %cst_13 = arith.constant dense<0.000000e+00> : vector<16x32xf32>
    %27 = tpu.matmul %25, %26, %cst_13 {dimension_numbers = #tpu.dot_dimension_numbers<[1], [0], [0], [1], [0, 0, 1, 1], [], []>} : vector<16x128xbf16>, vector<128x32xbf16>, vector<16x32xf32> -> vector<16x32xf32>
    %c0_14 = arith.constant 0 : index
    %c0_15 = arith.constant 0 : index
    %28 = vector.load %arg5[%c0_14, %c0_15] : memref<1x32xf32, #tpu.memory_space<vmem>>, vector<1x32xf32>
    %29 = vector.broadcast %28 : vector<1x32xf32> to vector<16x32xf32>
    %30 = arith.addf %27, %29 : vector<16x32xf32>
    %31 = arith.addf %30, %0 : vector<16x32xf32>
    %c0_16 = arith.constant 0 : index
    %c0_17 = arith.constant 0 : index
    %32 = vector.load %arg6[%c0_16, %c0_17] : memref<16x32xf32, #tpu.memory_space<vmem>>, vector<16x32xf32>
    tpu.vector_store %arg6[%c0_16, %c0_17], %31 {strides = array<i32>} : memref<16x32xf32, #tpu.memory_space<vmem>>, vector<16x32xf32>,
    return
  }
  func.func @transform_0(%arg0: i32) -> (i32, i32) {
    %c0_i32 = arith.constant 0 : i32
    %c0_i32_0 = arith.constant 0 : i32
    return %arg0, %c0_i32 : i32, i32
  }
  func.func @transform_1(%arg0: i32) -> (i32, i32) {
    %c0_i32 = arith.constant 0 : i32
    %c0_i32_0 = arith.constant 0 : i32
    %c0_i32_1 = arith.constant 0 : i32
    return %c0_i32, %c0_i32_0 : i32, i32
  }
  func.func @transform_2(%arg0: i32) -> (i32, i32) {
    %c0_i32 = arith.constant 0 : i32
    %c0_i32_0 = arith.constant 0 : i32
    %c0_i32_1 = arith.constant 0 : i32
    return %c0_i32, %c0_i32_0 : i32, i32
  }
  func.func @transform_3(%arg0: i32) -> (i32, i32) {
    %c0_i32 = arith.constant 0 : i32
    %c0_i32_0 = arith.constant 0 : i32
    %c0_i32_1 = arith.constant 0 : i32
    return %c0_i32, %c0_i32_0 : i32, i32
  }
  func.func @transform_4(%arg0: i32) -> (i32, i32) {
    %c0_i32 = arith.constant 0 : i32
    %c0_i32_0 = arith.constant 0 : i32
    %c0_i32_1 = arith.constant 0 : i32
    return %c0_i32, %c0_i32_0 : i32, i32
  }
  func.func @transform_5(%arg0: i32) -> (i32, i32) {
    %c0_i32 = arith.constant 0 : i32
    %c0_i32_0 = arith.constant 0 : i32
    return %arg0, %c0_i32 : i32, i32
  }
}

</mosaic_0001>

<bundles_post_ra>
// kernel: tpu_custom_call.1
= control target key start
LH: loop header
LB: loop body
LE: loop exit
PB: predicated region body
PF: predicated region fallthrough
CT: control target
= control target key end

     0   :  { %vm24_vm0 = vcmask 261120   ;;  %s456_s0 = inlined_call_operand.vmem [shape: f32[16,32], index: 0, kind: input, shape index: {}]   ;;  %s457_s1 = inlined_call_operand.vmem [shape: bf16[32,128], index: 1, kind: input, shape index: {}]   ;;  %s458_s2 = inlined_call_operand.vmem [shape: f32[1,128], index: 2, kind: input, shape index: {}]   ;;  %s459_s3 = inlined_call_operand.vmem [shape: bf16[128,32], index: 3, kind: input, shape index: {}]   ;;  %s460_s4 = inlined_call_operand.vmem [shape: f32[1,32], index: 4, kind: input, shape index: {}]   ;;  %s461_s5 = inlined_call_operand.hbm [shape: f32[16,32], index: 5, kind: output, shape index: {}]  }
   0x1   :  { %v388_v0 = vld [vmem:[%s456_s0] sm:$0xff]  ;;  %v393_v1 = vld [vmem:[%s456_s0 + $0x8] sm:$0xff] }
   0x2   :  { %v25_v2 = vsel %vm24_vm0, %v388_v0, 0.0  ;;  %v28_v3 = vsel %vm24_vm0, %v393_v1, 0.0 }
   0x3   :  { %26 = vadd.xlane.f32.xlu0 %v25_v2 }
   0x7   :  { %29 = vadd.xlane.f32.xlu0 %v28_v3 }
   0x8   :  { %10 = vsyncpa [#allocation3], 0  ;;  %v312_v14 = vld [vmem:[%s457_s1] sm:$0xff]   ;;  %v350_v15 = vmov 0.0   ;;  %vm351_vm1 = vmmov 0   ;;  %v313_v16 = vld [vmem:[%s457_s1 + $0x8] sm:$0xff]  }
   0x9   :  { %279 = vmatprep.subr.bf16.mxu0 %v350_v15  ;;  %283 = vmatprep.mubr.msk.bf16.mxu0 %vm351_vm1, %v350_v15  ;;  %v314_v17 = vld [vmem:[%s459_s3] sm:$0xff]   ;;  %v315_v18 = vld [vmem:[%s459_s3 + $0x8] sm:$0xff]   ;;  %v316_v19 = vld [vmem:[%s459_s3 + $0x10] sm:$0xff]  }
   0xa   :  { %280 = vmatpush3.bf16.msra.mxu0 %v312_v14  ;;  %287 = vmatprep.subr.bf16.mxu1 %v350_v15  ;;  %v317_v20 = vld [vmem:[%s459_s3 + $0x18] sm:$0xff]   ;;  %v318_v21 = vld [vmem:[%s459_s3 + $0x20] sm:$0xff]   ;;  %v319_v22 = vld [vmem:[%s459_s3 + $0x28] sm:$0xff]  }
   0xb   :  { %281 = vmatprep.subr.bf16.mxu0 %v350_v15  ;;  %303 = vmatprep.mubr.msk.bf16.mxu1 %vm351_vm1, %v350_v15  ;;  %v320_v34 = vld [vmem:[%s459_s3 + $0x30] sm:$0xff]   ;;  %v321_v35 = vld [vmem:[%s459_s3 + $0x38] sm:$0xff]   ;;  %v254_v36 = vld [vmem:[%s458_s2] ss:$0 sm:$0xff]  ;;  %s352_s3 = smov [#allocation2]  }
   0xc   :  { %288 = vmatpush3.bf16.msra.mxu1 %v314_v17  ;;  %v258_v46 = vld [vmem:[%s460_s4] ss:$0 sm:$0xff]  ;;  %s243_s19 = sshll.u32 %s352_s3, 4  ;;  %s244_s19 = int_to_ptr.vmem [resolvable:$true] %s243_s19 }
   0xd   :  { %289 = vmatprep.subr.bf16.mxu1 %v350_v15  ;;  %s326_s2 = scalar_lea.vmem %s244_s19, 256  ;;  %p331_p1 = scmp.lt.s32.totalorder %s244_s19, %s244_s19 }
   0xe   :  { %282 = vmatpush3.bf16.msra.mxu0 %v313_v16  ;;  %p327_p0 = scmp.ne.s32.totalorder %s244_s19, %s326_s2  ;;  %p332_p2 = scmp.lt.s32.totalorder %s326_s2, %s326_s2 }
  0x10   :  { %290 = vmatpush3.bf16.msra.mxu1 %v315_v18  ;;  %p333_p3 = por %p332_p2, %p331_p1 }
  0x11   :  { %291 = vmatprep.subr.bf16.mxu1 %v350_v15 }
  0x12   :  { %p334_p4 = pnand %p333_p3, %p327_p0 }
  0x14   :  { %292 = vmatpush3.bf16.msra.mxu1 %v316_v19 }
  0x15   :  { %293 = vmatprep.subr.bf16.mxu1 %v350_v15 }
  0x18   :  { %294 = vmatpush3.bf16.msra.mxu1 %v317_v20 }
  0x19   :  { %295 = vmatprep.subr.bf16.mxu1 %v350_v15 }
  0x1c   :  { %296 = vmatpush3.bf16.msra.mxu1 %v318_v21 }
  0x1d   :  { %297 = vmatprep.subr.bf16.mxu1 %v350_v15 }
  0x20   :  { %298 = vmatpush3.bf16.msra.mxu1 %v319_v22 }
  0x21   :  { %299 = vmatprep.subr.bf16.mxu1 %v350_v15 }
  0x24   :  { %300 = vmatpush3.bf16.msra.mxu1 %v320_v34 }
  0x25   :  { %301 = vmatprep.subr.bf16.mxu1 %v350_v15 }
  0x28   :  { %302 = vmatpush3.bf16.msra.mxu1 %v321_v35 }
  0x90   :  { %v27_v4 = vpop.xlane.xlu0 %26 }
  0x91   :  { %v31_v5 = vmul.f32 0.03125, %v27_v4 }
  0x93   :  { %v33_v6 = vsub.f32 %v388_v0, %v31_v5 }
  0x94   :  { %v30_v7 = vpop.xlane.xlu0 %29 }
  0x95   :  { %v32_v8 = vmul.f32 0.03125, %v30_v7  ;;  %v35_v9 = vmul.f32 %v33_v6, %v33_v6 }
  0x97   :  { %v34_v10 = vsub.f32 %v393_v1, %v32_v8  ;;  %v37_v11 = vsel %vm24_vm0, %v35_v9, 0.0 }
  0x98   :  { %38 = vadd.xlane.f32.xlu1 %v37_v11 }
  0x99   :  { %v36_v12 = vmul.f32 %v34_v10, %v34_v10 }
  0x9b   :  { %v40_v13 = vsel %vm24_vm0, %v36_v12, 0.0 }
  0x9c   :  { %41 = vadd.xlane.f32.xlu1 %v40_v13 }
 0x125   :  { %v39_v23 = vpop.xlane.xlu1 %38 }
 0x126   :  { %v43_v24 = vmul.f32 0.03125, %v39_v23 }
 0x128   :  { %v45_v25 = vadd.f32 1e-05, %v43_v24 }
 0x129   :  { %v42_v26 = vpop.xlane.xlu1 %41 }
 0x12a   :  { %v44_v27 = vmul.f32 0.03125, %v42_v26  ;;  %322 = vrsqrt.f32 %v45_v25 }
 0x12c   :  { %v46_v28 = vadd.f32 1e-05, %v44_v27 }
 0x12e   :  { %324 = vrsqrt.f32 %v46_v28 }
 0x134   :  { %v323_v29 = vpop.eup %322 }
 0x135   :  { %v49_v31 = vmul.f32 %v323_v29, %v33_v6 }
 0x138   :  { %v325_v30 = vpop.eup %324 }
 0x139   :  { %v50_v32 = vmul.f32 %v325_v30, %v34_v10 }
 0x13b   :  { %v51_v33 = vpack.c.bf16 %v50_v32, %v49_v31 }
 0x13d   :  { %284 = vmatmul.mubr.msk.bf16.vlgmr.msra.gmra.mrb[0].mxu0 %vm24_vm0, %v51_v33 }
 0x210   :  { %v112_v37 = vpop.f32.mrb[0].mxu0 }
 0x211   :  { %v113_v38 = vadd.f32 %v254_v36, %v112_v37  ;;  %v285_v39 = vpop.f32.mrb[1].mxu0 }
 0x212   :  { %v115_v40 = vpop.f32.mrb[2].mxu0 }
 0x213   :  { %v116_v41 = vadd.f32 %v254_v36, %v115_v40  ;;  %v286_v42 = vpop.f32.mrb[3].mxu0  ;;  %v119_v43 = vmax.f32 %v113_v38, 0.0 }
 0x215   :  { %v120_v44 = vmax.f32 %v116_v41, 0.0 }
 0x217   :  { %v121_v45 = vpack.c.bf16 %v120_v44, %v119_v43 }
 0x219   :  { %304 = vmatmul.mubr.bf16.vlgmr.msra.gmra.mrb[0].mxu1 %v121_v45 }
 0x2ec   :  { %v227_v47 = vpop.f32.mrb[0].mxu1 }
 0x2ed   :  { %v228_v48 = vadd.f32 %v258_v46, %v227_v47  ;;  %v305_v49 = vpop.f32.mrb[1].mxu1 }
 0x2ee   :  { %v230_v50 = vpop.f32.mrb[2].mxu1 }
 0x2ef   :  { %v234_v51 = vadd.f32 %v228_v48, %v388_v0  ;;  %v231_v52 = vadd.f32 %v258_v46, %v230_v50  ;;  %v306_v53 = vpop.f32.mrb[3].mxu1 }
 0x2f1   :  { %236 = vst.msk [vmem:[#allocation2] sm:$0xff] %vm24_vm0, %v234_v51  ;;  %v235_v54 = vadd.f32 %v231_v52, %v393_v1 }
 0x2f3   :  { %237 = vst.msk [vmem:[#allocation2 + $0x8] sm:$0xff] %vm24_vm0, %v235_v54 }
 0x2f4   :  { %337 = shalt.err (!%p334_p4)
}
 0x2f5   :  { %s338_s21 = scalar_lea.hbm %s461_s5, 256 }
 0x2f6   :  { %p339_p5 = scmp.ne.s32.totalorder %s461_s5, %s338_s21  ;;  %p342_p6 = scmp.lt.u32.totalorder %s338_s21, %s461_s5 }
 0x2f8   :  { %p344_p7 = pnand %p342_p6, %p339_p5 }
 0x2fa   :  { %347 = shalt.err (!%p344_p7)
}
 0x2fb   :  { %s353_s25 = smov 128   ;;  %s354_s26 = smov 8  }
 0x2fc   :  { %249 = dma.vmem_to_hbm [thread:$0]  %s244_s19, 256, %s461_s5, [#allocation3], %s353_s25, %s353_s25, %s354_s26  }
 0x2fd   :  { %348 = dma.done.wait [#allocation3], 256  }
 0x2fe   :  { %349 = vsyncadd [#allocation3], 4294967040 }
 0x2ff   :  { %253 = vsyncpa [#allocation3], 1 }

</bundles_post_ra>
